<compile_context>
chip_gen: v5e
topology: v5e:2x2
jax: 0.10.0
libtpu: 0.0.40
codegen_flags: <defaults>
</compile_context>

<pallas_src>
import jax
import jax.numpy as jnp
import numpy as np
from jax.experimental import pallas as pl
from jax.experimental.pallas import tpu as pltpu


# --------------------------------- kernel ------------------------------------

def conv_model_kernel(x_ref, w1_ref, bst1_ref, w2_ref, bst2_ref,
                      fw1_ref, fw2_ref, w3_ref, fcb_ref, out_ref):
    x = x_ref[...]                                            # (TB, L*F)

    # ---- Block 1: banded conv matmul; lane halves = even / odd positions ----
    h = jnp.dot(x, w1_ref[...], preferred_element_type=jnp.float32)  # (TB, 256)
    b1 = bst1_ref[0:1, :]
    s1 = bst1_ref[1:2, :]
    t1 = bst1_ref[2:3, :]
    ae = jnp.maximum(h[:, 0:128] + b1, 0.0) * s1 + t1         # even positions
    ao = jnp.maximum(h[:, 128:256] + b1, 0.0) * s1 + t1       # odd positions
    p1 = jnp.maximum(ae, ao)                                  # (TB, 128) = (TB, 4*32)

    # ---- Block 2: banded conv matmul; lane halves = even / odd positions ----
    g = jnp.dot(p1, w2_ref[...], preferred_element_type=jnp.float32)  # (TB, 256)
    b2 = bst2_ref[0:1, :]
    s2 = bst2_ref[1:2, :]
    t2 = bst2_ref[2:3, :]
    ce = jnp.maximum(g[:, 0:128] + b2, 0.0) * s2 + t2
    co = jnp.maximum(g[:, 128:256] + b2, 0.0) * s2 + t2
    p2 = jnp.maximum(ce, co)                                  # (TB, 128) = (TB, 2*64)

    # ---- FC head: Linear(128,64)+ReLU, Linear(64,32)+ReLU, Linear(32,1)+Sig --
    y = jnp.dot(p2, fw1_ref[...], preferred_element_type=jnp.float32)
    y = jnp.maximum(y + fcb_ref[0:1, :], 0.0)                 # (TB, 64)
    y = jnp.dot(y, fw2_ref[...], preferred_element_type=jnp.float32)
    y = jnp.maximum(y + fcb_ref[1:2, 0:32], 0.0)              # (TB, 32)
    # final layer transposed: (1,32) contracted with (TB,32) -> lane-dense (1,TB)
    z = jax.lax.dot_general(w3_ref[...], y, (((1,), (1,)), ((), ())),
                            preferred_element_type=jnp.float32)
    out_ref[0] = jax.nn.sigmoid(z + fcb_ref[2:3, 0:1])


# --------------------------------- wrapper -----------------------------------

def _banded_conv_weight(w, L_in, out_positions):
    """w: (Cout, Cin, 3) torch Conv1d weight (stride=1, padding=1).

    Returns (L_in*Cin, len(out_positions)*Cout) such that
      x_flat @ W  ==  conv(x) at the listed output positions,
    with x_flat position-major / channel-fastest and zero padding folded in
    (out-of-range taps are omitted)."""
    Cout, Cin, K = w.shape
    W = jnp.zeros((L_in * Cin, len(out_positions) * Cout), jnp.float32)
    for p, lo in enumerate(out_positions):
        for k in range(K):
            li = lo + k - 1
            if 0 <= li < L_in:
                W = W.at[li * Cin:(li + 1) * Cin,
                         p * Cout:(p + 1) * Cout].set(jnp.transpose(w[:, :, k]))
    return W


def conv_model_forward(x, params, tile_b=512):
    """x: (B, L, F) float32 with L == 8 (Linear(128,...) implies 64 * L/4 == 128)."""
    B, L, F = x.shape
    assert L == 8, "ConvModel's Linear(128, ...) implies sequence length 8"

    (conv1_w, conv1_b, bn1_g, bn1_b, bn1_m, bn1_v,
     conv2_w, conv2_b, bn2_g, bn2_b, bn2_m, bn2_v,
     fc1_w, fc1_b, fc2_w, fc2_b, fc3_w, fc3_b) = params
    eps = 1e-5
    f32 = jnp.float32

    # --- banded conv weights: [even positions | odd positions] along lanes ---
    w1band = jnp.concatenate(
        [_banded_conv_weight(conv1_w, L, (0, 2, 4, 6)),
         _banded_conv_weight(conv1_w, L, (1, 3, 5, 7))], axis=1)   # (L*F, 256)
    w2band = jnp.concatenate(
        [_banded_conv_weight(conv2_w, L // 2, (0, 2)),
         _banded_conv_weight(conv2_w, L // 2, (1, 3))], axis=1)    # (128, 256)

    # --- folded BN affine, tiled to the position-major column layout ---------
    s1 = bn1_g / jnp.sqrt(bn1_v + eps)
    bst1 = jnp.stack([jnp.tile(conv1_b, 4), jnp.tile(s1, 4),
                      jnp.tile(bn1_b - bn1_m * s1, 4)], axis=0)    # (3, 128)
    s2 = bn2_g / jnp.sqrt(bn2_v + eps)
    bst2 = jnp.stack([jnp.tile(conv2_b, 2), jnp.tile(s2, 2),
                      jnp.tile(bn2_b - bn2_m * s2, 2)], axis=0)    # (3, 128)

    # torch flatten of (B, 64, 2) is channel-major (c*2 + l); the kernel's layout
    # is position-major (l*64 + c), so reorder fc1_w accordingly (one-time op).
    fw1 = jnp.transpose(fc1_w.reshape(64, 64, 2), (2, 1, 0)).reshape(128, 64)
    fw2 = fc2_w.T                                                   # (64, 32)
    w3r = fc3_w                                                     # (1, 32)
    fcb = jnp.zeros((3, 64), f32)
    fcb = fcb.at[0, :].set(fc1_b)
    fcb = fcb.at[1, :32].set(fc2_b)
    fcb = fcb.at[2, 0].set(fc3_b[0])

    # --- batch tiling: TB multiple of 128; keep G >= 2 when the padded batch
    #     spans >= 2 lane tiles so both v7x TensorCores get work --------------
    TB = max(128, (int(tile_b) // 128) * 128)
    Bp = ((B + 127) // 128) * 128
    if Bp >= 256:
        TB = min(TB, max(128, ((Bp // 2) // 128) * 128))
    else:
        TB = 128
    G = pl.cdiv(Bp, TB)
    B_pad = G * TB

    xf = x.astype(f32).reshape(B, L * F)                            # lane-packed
    xf = jnp.pad(xf, ((0, B_pad - B), (0, 0)))

    weights = [w1band, bst1, w2band, bst2, fw1, fw2, w3r, fcb]
    in_specs = [pl.BlockSpec((TB, L * F), lambda i: (i, 0))]
    for w in weights:
        in_specs.append(pl.BlockSpec(w.shape, lambda i: (0, 0)))    # constant -> fetched once

    out = pl.pallas_call(
        conv_model_kernel,
        out_shape=jax.ShapeDtypeStruct((G, 1, TB), f32),
        grid=(G,),
        in_specs=in_specs,
        out_specs=pl.BlockSpec((1, 1, TB), lambda i: (i, 0, 0)),
        compiler_params=pltpu.CompilerParams(
            dimension_semantics=("parallel",),
            vmem_limit_bytes=48 * 1024 * 1024),   # safe on v5e/v6e (128 MiB) and v7x (64 MiB)
    )(xf, *weights)

    return out.reshape(B_pad, 1)[:B]                                # (B, 1)


# ------------------------------ pure-JAX reference ----------------------------

def reference_forward(x, params):
    """Mirrors the PyTorch forward in NCL layout (eval-mode BN)."""
    (conv1_w, conv1_b, bn1_g, bn1_b, bn1_m, bn1_v,
     conv2_w, conv2_b, bn2_g, bn2_b, bn2_m, bn2_v,
     fc1_w, fc1_b, fc2_w, fc2_b, fc3_w, fc3_b) = params
    eps = 1e-5
    hi = jax.lax.Precision.HIGHEST

    xc = jnp.transpose(x, (0, 2, 1))                       # (B, F, L)

    def block(xc, w, b, g, bt, m, v):
        B_, Cin, L = xc.shape
        xp = jnp.pad(xc, ((0, 0), (0, 0), (1, 1)))
        out = jnp.zeros((B_, w.shape[0], L), jnp.float32)
        for k in range(3):
            out = out + jnp.einsum('bil,oi->bol', xp[:, :, k:k + L], w[:, :, k],
                                   precision=hi)
        out = out + b[None, :, None]
        out = jnp.maximum(out, 0.0)
        out = ((out - m[None, :, None]) / jnp.sqrt(v[None, :, None] + eps)
               * g[None, :, None] + bt[None, :, None])
        Bq, C, Lq = out.shape
        return out.reshape(Bq, C, Lq // 2, 2).max(-1)

    h = block(xc, conv1_w, conv1_b, bn1_g, bn1_b, bn1_m, bn1_v)
    h = block(h, conv2_w, conv2_b, bn2_g, bn2_b, bn2_m, bn2_v)
    flat = h.reshape(h.shape[0], -1)                        # torch .view(B, -1)
    y = jnp.maximum(jnp.dot(flat, fc1_w.T, precision=hi) + fc1_b, 0.0)
    y = jnp.maximum(jnp.dot(y, fc2_w.T, precision=hi) + fc2_b, 0.0)
    y = jax.nn.sigmoid(jnp.dot(y, fc3_w.T, precision=hi) + fc3_b)
    return y


# ----------------------------------- main -------------------------------------

if __name__ == "__main__":
    feature_size, B, L = 4, 2, 8
    key = jax.random.PRNGKey(0)
    ks = jax.random.split(key, 11)

    f32 = jnp.float32
    conv1_w = jax.random.normal(ks[0], (32, feature_size, 3), f32) * 0.2
    conv1_b = jax.random.normal(ks[1], (32,), f32) * 0.1
    conv2_w = jax.random.normal(ks[2], (64, 32, 3), f32) * 0.1
    conv2_b = jax.random.normal(ks[3], (64,), f32) * 0.1
    fc1_w = jax.random.normal(ks[4], (64, 128), f32) * 0.1
    fc1_b = jax.random.normal(ks[5], (64,), f32) * 0.1
    fc2_w = jax.random.normal(ks[6], (32, 64), f32) * 0.1
    fc2_b = jax.random.normal(ks[7], (32,), f32) * 0.1
    fc3_w = jax.random.normal(ks[8], (1, 32), f32) * 0.1
    fc3_b = jnp.zeros((1,), f32)

    bn1_g, bn1_b_, bn1_m, bn1_v = (jnp.ones((32,), f32), jnp.zeros((32,), f32),
                                   jnp.zeros((32,), f32), jnp.ones((32,), f32))
    bn2_g, bn2_b_, bn2_m, bn2_v = (jnp.ones((64,), f32), jnp.zeros((64,), f32),
                                   jnp.zeros((64,), f32), jnp.ones((64,), f32))

    params = (conv1_w, conv1_b, bn1_g, bn1_b_, bn1_m, bn1_v,
              conv2_w, conv2_b, bn2_g, bn2_b_, bn2_m, bn2_v,
              fc1_w, fc1_b, fc2_w, fc2_b, fc3_w, fc3_b)

    # small required check: B = 2 (single tile, default tile_b)
    x = jax.random.normal(ks[9], (B, L, feature_size), f32)
    out = jax.block_until_ready(conv_model_forward(x, params))
    ref = jax.block_until_ready(reference_forward(x, params))
    assert out.shape == (B, 1), out.shape
    np.testing.assert_allclose(np.asarray(out), np.asarray(ref),
                               rtol=1e-4, atol=1e-4)

    # multi-tile path (grid > 1, batch padding, G >= 2 for v7x dual-core)
    B2 = 300
    x2 = jax.random.normal(ks[10], (B2, L, feature_size), f32)
    out2 = jax.block_until_ready(conv_model_forward(x2, params, tile_b=256))
    ref2 = jax.block_until_ready(reference_forward(x2, params))
    np.testing.assert_allclose(np.asarray(out2), np.asarray(ref2),
                               rtol=1e-4, atol=1e-4)

    print("KERNEL_OK")
</pallas_src>

<mosaic_0001>
module attributes {stable_mosaic.version = 11 : i64} {
  func.func @conv_model_kernel(%arg0: i32, %arg1: memref<128x32xf32, #tpu.memory_space<vmem>>, %arg2: memref<32x256xf32, #tpu.memory_space<vmem>>, %arg3: memref<3x128xf32, #tpu.memory_space<vmem>>, %arg4: memref<128x256xf32, #tpu.memory_space<vmem>>, %arg5: memref<3x128xf32, #tpu.memory_space<vmem>>, %arg6: memref<128x64xf32, #tpu.memory_space<vmem>>, %arg7: memref<64x32xf32, #tpu.memory_space<vmem>>, %arg8: memref<1x32xf32, #tpu.memory_space<vmem>>, %arg9: memref<3x64xf32, #tpu.memory_space<vmem>>, %arg10: memref<1x1x128xf32, #tpu.memory_space<vmem>>) attributes {dimension_semantics = [#tpu.dimension_semantics<parallel>], iteration_bounds = array<i64: 1>, scalar_prefetch = 0 : i64, scratch_operands = 0 : i64, tpu.core_type = #tpu.core_type<tc>, window_params = [{transform_indices = @transform_0, window_bounds = array<i64: 128, 32>}, {pipeline_mode = #tpu.pipeline_mode<synchronous>, transform_indices = @transform_1, window_bounds = array<i64: 32, 256>}, {pipeline_mode = #tpu.pipeline_mode<synchronous>, transform_indices = @transform_2, window_bounds = array<i64: 3, 128>}, {pipeline_mode = #tpu.pipeline_mode<synchronous>, transform_indices = @transform_3, window_bounds = array<i64: 128, 256>}, {pipeline_mode = #tpu.pipeline_mode<synchronous>, transform_indices = @transform_4, window_bounds = array<i64: 3, 128>}, {pipeline_mode = #tpu.pipeline_mode<synchronous>, transform_indices = @transform_5, window_bounds = array<i64: 128, 64>}, {pipeline_mode = #tpu.pipeline_mode<synchronous>, transform_indices = @transform_6, window_bounds = array<i64: 64, 32>}, {pipeline_mode = #tpu.pipeline_mode<synchronous>, transform_indices = @transform_7, window_bounds = array<i64: 1, 32>}, {pipeline_mode = #tpu.pipeline_mode<synchronous>, transform_indices = @transform_8, window_bounds = array<i64: 3, 64>}, {transform_indices = @transform_9, window_bounds = array<i64: 1, 1, 128>}]} {
    %c0 = arith.constant 0 : index
    %c0_0 = arith.constant 0 : index
    %0 = vector.load %arg1[%c0, %c0_0] : memref<128x32xf32, #tpu.memory_space<vmem>>, vector<128x32xf32>
    %c0_1 = arith.constant 0 : index
    %c0_2 = arith.constant 0 : index
    %1 = vector.load %arg2[%c0_1, %c0_2] : memref<32x256xf32, #tpu.memory_space<vmem>>, vector<32x256xf32>
    %cst = arith.constant dense<0.000000e+00> : vector<128x256xf32>
    %2 = tpu.matmul %0, %1, %cst {dimension_numbers = #tpu.dot_dimension_numbers<[1], [0], [0], [1], [0, 0, 1, 1], [], []>} : vector<128x32xf32>, vector<32x256xf32>, vector<128x256xf32> -> vector<128x256xf32>
    %c0_3 = arith.constant 0 : index
    %c0_4 = arith.constant 0 : index
    %3 = vector.load %arg3[%c0_3, %c0_4] : memref<3x128xf32, #tpu.memory_space<vmem>>, vector<1x128xf32>
    %c1 = arith.constant 1 : index
    %c0_5 = arith.constant 0 : index
    %4 = vector.load %arg3[%c1, %c0_5] : memref<3x128xf32, #tpu.memory_space<vmem>>, vector<1x128xf32>
    %c2 = arith.constant 2 : index
    %c0_6 = arith.constant 0 : index
    %5 = vector.load %arg3[%c2, %c0_6] : memref<3x128xf32, #tpu.memory_space<vmem>>, vector<1x128xf32>
    %6 = vector.extract_strided_slice %2 {offsets = [0, 0], sizes = [128, 128], strides = [1, 1]} : vector<128x256xf32> to vector<128x128xf32>
    %7 = vector.broadcast %3 : vector<1x128xf32> to vector<128x128xf32>
    %8 = arith.addf %6, %7 : vector<128x128xf32>
    %cst_7 = arith.constant 0.000000e+00 : f32
    %9 = vector.broadcast %cst_7 : f32 to vector<128x128xf32>
    %10 = arith.maximumf %8, %9 : vector<128x128xf32>
    %11 = vector.broadcast %4 : vector<1x128xf32> to vector<128x128xf32>
    %12 = arith.mulf %10, %11 : vector<128x128xf32>
    %13 = vector.broadcast %5 : vector<1x128xf32> to vector<128x128xf32>
    %14 = arith.addf %12, %13 : vector<128x128xf32>
    %15 = vector.extract_strided_slice %2 {offsets = [0, 128], sizes = [128, 128], strides = [1, 1]} : vector<128x256xf32> to vector<128x128xf32>
    %16 = vector.broadcast %3 : vector<1x128xf32> to vector<128x128xf32>
    %17 = arith.addf %15, %16 : vector<128x128xf32>
    %cst_8 = arith.constant 0.000000e+00 : f32
    %18 = vector.broadcast %cst_8 : f32 to vector<128x128xf32>
    %19 = arith.maximumf %17, %18 : vector<128x128xf32>
    %20 = vector.broadcast %4 : vector<1x128xf32> to vector<128x128xf32>
    %21 = arith.mulf %19, %20 : vector<128x128xf32>
    %22 = vector.broadcast %5 : vector<1x128xf32> to vector<128x128xf32>
    %23 = arith.addf %21, %22 : vector<128x128xf32>
    %24 = arith.maximumf %14, %23 : vector<128x128xf32>
    %c0_9 = arith.constant 0 : index
    %c0_10 = arith.constant 0 : index
    %25 = vector.load %arg4[%c0_9, %c0_10] : memref<128x256xf32, #tpu.memory_space<vmem>>, vector<128x256xf32>
    %cst_11 = arith.constant dense<0.000000e+00> : vector<128x256xf32>
    %26 = tpu.matmul %24, %25, %cst_11 {dimension_numbers = #tpu.dot_dimension_numbers<[1], [0], [0], [1], [0, 0, 1, 1], [], []>} : vector<128x128xf32>, vector<128x256xf32>, vector<128x256xf32> -> vector<128x256xf32>
    %c0_12 = arith.constant 0 : index
    %c0_13 = arith.constant 0 : index
    %27 = vector.load %arg5[%c0_12, %c0_13] : memref<3x128xf32, #tpu.memory_space<vmem>>, vector<1x128xf32>
    %c1_14 = arith.constant 1 : index
    %c0_15 = arith.constant 0 : index
    %28 = vector.load %arg5[%c1_14, %c0_15] : memref<3x128xf32, #tpu.memory_space<vmem>>, vector<1x128xf32>
    %c2_16 = arith.constant 2 : index
    %c0_17 = arith.constant 0 : index
    %29 = vector.load %arg5[%c2_16, %c0_17] : memref<3x128xf32, #tpu.memory_space<vmem>>, vector<1x128xf32>
    %30 = vector.extract_strided_slice %26 {offsets = [0, 0], sizes = [128, 128], strides = [1, 1]} : vector<128x256xf32> to vector<128x128xf32>
    %31 = vector.broadcast %27 : vector<1x128xf32> to vector<128x128xf32>
    %32 = arith.addf %30, %31 : vector<128x128xf32>
    %cst_18 = arith.constant 0.000000e+00 : f32
    %33 = vector.broadcast %cst_18 : f32 to vector<128x128xf32>
    %34 = arith.maximumf %32, %33 : vector<128x128xf32>
    %35 = vector.broadcast %28 : vector<1x128xf32> to vector<128x128xf32>
    %36 = arith.mulf %34, %35 : vector<128x128xf32>
    %37 = vector.broadcast %29 : vector<1x128xf32> to vector<128x128xf32>
    %38 = arith.addf %36, %37 : vector<128x128xf32>
    %39 = vector.extract_strided_slice %26 {offsets = [0, 128], sizes = [128, 128], strides = [1, 1]} : vector<128x256xf32> to vector<128x128xf32>
    %40 = vector.broadcast %27 : vector<1x128xf32> to vector<128x128xf32>
    %41 = arith.addf %39, %40 : vector<128x128xf32>
    %cst_19 = arith.constant 0.000000e+00 : f32
    %42 = vector.broadcast %cst_19 : f32 to vector<128x128xf32>
    %43 = arith.maximumf %41, %42 : vector<128x128xf32>
    %44 = vector.broadcast %28 : vector<1x128xf32> to vector<128x128xf32>
    %45 = arith.mulf %43, %44 : vector<128x128xf32>
    %46 = vector.broadcast %29 : vector<1x128xf32> to vector<128x128xf32>
    %47 = arith.addf %45, %46 : vector<128x128xf32>
    %48 = arith.maximumf %38, %47 : vector<128x128xf32>
    %c0_20 = arith.constant 0 : index
    %c0_21 = arith.constant 0 : index
    %49 = vector.load %arg6[%c0_20, %c0_21] : memref<128x64xf32, #tpu.memory_space<vmem>>, vector<128x64xf32>
    %cst_22 = arith.constant dense<0.000000e+00> : vector<128x64xf32>
    %50 = tpu.matmul %48, %49, %cst_22 {dimension_numbers = #tpu.dot_dimension_numbers<[1], [0], [0], [1], [0, 0, 1, 1], [], []>} : vector<128x128xf32>, vector<128x64xf32>, vector<128x64xf32> -> vector<128x64xf32>
    %c0_23 = arith.constant 0 : index
    %c0_24 = arith.constant 0 : index
    %51 = vector.load %arg9[%c0_23, %c0_24] : memref<3x64xf32, #tpu.memory_space<vmem>>, vector<1x64xf32>
    %52 = vector.broadcast %51 : vector<1x64xf32> to vector<128x64xf32>
    %53 = arith.addf %50, %52 : vector<128x64xf32>
    %cst_25 = arith.constant 0.000000e+00 : f32
    %54 = vector.broadcast %cst_25 : f32 to vector<128x64xf32>
    %55 = arith.maximumf %53, %54 : vector<128x64xf32>
    %c0_26 = arith.constant 0 : index
    %c0_27 = arith.constant 0 : index
    %56 = vector.load %arg7[%c0_26, %c0_27] : memref<64x32xf32, #tpu.memory_space<vmem>>, vector<64x32xf32>
    %cst_28 = arith.constant dense<0.000000e+00> : vector<128x32xf32>
    %57 = tpu.matmul %55, %56, %cst_28 {dimension_numbers = #tpu.dot_dimension_numbers<[1], [0], [0], [1], [0, 0, 1, 1], [], []>} : vector<128x64xf32>, vector<64x32xf32>, vector<128x32xf32> -> vector<128x32xf32>
    %c1_29 = arith.constant 1 : index
    %c0_30 = arith.constant 0 : index
    %58 = vector.load %arg9[%c1_29, %c0_30] : memref<3x64xf32, #tpu.memory_space<vmem>>, vector<1x32xf32>
    %59 = vector.broadcast %58 : vector<1x32xf32> to vector<128x32xf32>
    %60 = arith.addf %57, %59 : vector<128x32xf32>
    %cst_31 = arith.constant 0.000000e+00 : f32
    %61 = vector.broadcast %cst_31 : f32 to vector<128x32xf32>
    %62 = arith.maximumf %60, %61 : vector<128x32xf32>
    %c0_32 = arith.constant 0 : index
    %c0_33 = arith.constant 0 : index
    %63 = vector.load %arg8[%c0_32, %c0_33] : memref<1x32xf32, #tpu.memory_space<vmem>>, vector<1x32xf32>
    %cst_34 = arith.constant dense<0.000000e+00> : vector<1x128xf32>
    %64 = tpu.matmul %63, %62, %cst_34 {dimension_numbers = #tpu.dot_dimension_numbers<[1], [1], [0], [0], [0, 0, 1, 0], [], []>} : vector<1x32xf32>, vector<128x32xf32>, vector<1x128xf32> -> vector<1x128xf32>
    %c2_35 = arith.constant 2 : index
    %c0_36 = arith.constant 0 : index
    %65 = vector.load %arg9[%c2_35, %c0_36] : memref<3x64xf32, #tpu.memory_space<vmem>>, vector<1x1xf32>
    %66 = vector.broadcast %65 : vector<1x1xf32> to vector<1x128xf32>
    %67 = arith.addf %64, %66 : vector<1x128xf32>
    %68 = arith.negf %67 : vector<1x128xf32>
    %69 = math.exp %68 : vector<1x128xf32>
    %cst_37 = arith.constant 1.000000e+00 : f32
    %70 = vector.broadcast %cst_37 : f32 to vector<1x128xf32>
    %71 = arith.addf %70, %69 : vector<1x128xf32>
    %72 = arith.divf %70, %71 : vector<1x128xf32>
    %c0_38 = arith.constant 0 : index
    %c0_39 = arith.constant 0 : index
    %c0_40 = arith.constant 0 : index
    %73 = vector.load %arg10[%c0_38, %c0_39, %c0_40] : memref<1x1x128xf32, #tpu.memory_space<vmem>>, vector<1x1x128xf32>
    %74 = vector.shape_cast %73 : vector<1x1x128xf32> to vector<1x128xf32>
    %75 = vector.shape_cast %72 : vector<1x128xf32> to vector<1x1x128xf32>
    tpu.vector_store %arg10[%c0_38, %c0_39, %c0_40], %75 {strides = array<i32>} : memref<1x1x128xf32, #tpu.memory_space<vmem>>, vector<1x1x128xf32>,
    return
  }
  func.func @transform_0(%arg0: i32) -> (i32, i32) {
    %c0_i32 = arith.constant 0 : i32
    %c0_i32_0 = arith.constant 0 : i32
    return %arg0, %c0_i32 : i32, i32
  }
  func.func @transform_1(%arg0: i32) -> (i32, i32) {
    %c0_i32 = arith.constant 0 : i32
    %c0_i32_0 = arith.constant 0 : i32
    %c0_i32_1 = arith.constant 0 : i32
    return %c0_i32, %c0_i32_0 : i32, i32
  }
  func.func @transform_2(%arg0: i32) -> (i32, i32) {
    %c0_i32 = arith.constant 0 : i32
    %c0_i32_0 = arith.constant 0 : i32
    %c0_i32_1 = arith.constant 0 : i32
    return %c0_i32, %c0_i32_0 : i32, i32
  }
  func.func @transform_3(%arg0: i32) -> (i32, i32) {
    %c0_i32 = arith.constant 0 : i32
    %c0_i32_0 = arith.constant 0 : i32
    %c0_i32_1 = arith.constant 0 : i32
    return %c0_i32, %c0_i32_0 : i32, i32
  }
  func.func @transform_4(%arg0: i32) -> (i32, i32) {
    %c0_i32 = arith.constant 0 : i32
    %c0_i32_0 = arith.constant 0 : i32
    %c0_i32_1 = arith.constant 0 : i32
    return %c0_i32, %c0_i32_0 : i32, i32
  }
  func.func @transform_5(%arg0: i32) -> (i32, i32) {
    %c0_i32 = arith.constant 0 : i32
    %c0_i32_0 = arith.constant 0 : i32
    %c0_i32_1 = arith.constant 0 : i32
    return %c0_i32, %c0_i32_0 : i32, i32
  }
  func.func @transform_6(%arg0: i32) -> (i32, i32) {
    %c0_i32 = arith.constant 0 : i32
    %c0_i32_0 = arith.constant 0 : i32
    %c0_i32_1 = arith.constant 0 : i32
    return %c0_i32, %c0_i32_0 : i32, i32
  }
  func.func @transform_7(%arg0: i32) -> (i32, i32) {
    %c0_i32 = arith.constant 0 : i32
    %c0_i32_0 = arith.constant 0 : i32
    %c0_i32_1 = arith.constant 0 : i32
    return %c0_i32, %c0_i32_0 : i32, i32
  }
  func.func @transform_8(%arg0: i32) -> (i32, i32) {
    %c0_i32 = arith.constant 0 : i32
    %c0_i32_0 = arith.constant 0 : i32
    %c0_i32_1 = arith.constant 0 : i32
    return %c0_i32, %c0_i32_0 : i32, i32
  }
  func.func @transform_9(%arg0: i32) -> (i32, i32, i32) {
    %c0_i32 = arith.constant 0 : i32
    %c0_i32_0 = arith.constant 0 : i32
    %c0_i32_1 = arith.constant 0 : i32
    return %arg0, %c0_i32, %c0_i32_0 : i32, i32, i32
  }
}

</mosaic_0001>

<bundles_post_ra>
// kernel: tpu_custom_call.1
= control target key start
LH: loop header
LB: loop body
LE: loop exit
PB: predicated region body
PF: predicated region fallthrough
CT: control target
= control target key end

     0   :  { %vm57_vm0 = vcmask 261120   ;;  %s1781_s0 = inlined_call_operand.vmem [shape: f32[128,32], index: 0, kind: input, shape index: {}]   ;;  %s1782_s1 = inlined_call_operand.vmem [shape: f32[32,256], index: 1, kind: input, shape index: {}]   ;;  %s1783_s2 = inlined_call_operand.vmem [shape: f32[3,128], index: 2, kind: input, shape index: {}]   ;;  %s1784_s3 = inlined_call_operand.vmem [shape: f32[128,256], index: 3, kind: input, shape index: {}]   ;;  %s1785_s4 = inlined_call_operand.vmem [shape: f32[3,128], index: 4, kind: input, shape index: {}]   ;;  %s1786_s5 = inlined_call_operand.vmem [shape: f32[128,64], index: 5, kind: input, shape index: {}]   ;;  %s1787_s6 = inlined_call_operand.vmem [shape: f32[64,32], index: 6, kind: input, shape index: {}]   ;;  %s1788_s7 = inlined_call_operand.vmem [shape: f32[1,32], index: 7, kind: input, shape index: {}]   ;;  %s1789_s8 = inlined_call_operand.vmem [shape: f32[3,64], index: 8, kind: input, shape index: {}]   ;;  %s1790_s9 = inlined_call_operand.hbm [shape: f32[1,1,128], index: 9, kind: output, shape index: {}]  }
   0x1   :  { %v55_v0 = vld [vmem:[%s1782_s1 + $0x30] sm:$0xff]  ;;  %v56_v1 = vld [vmem:[%s1782_s1 + $0x38] sm:$0xff]  ;;  %v53_v2 = vld [vmem:[%s1782_s1 + $0x20] sm:$0xff] }
   0x2   :  { %118 = vmatpush.msra.mxu0 %v55_v0  ;;  %183 = vmatpush.msra.mxu1 %v56_v1  ;;  %v54_v3 = vld [vmem:[%s1782_s1 + $0x28] sm:$0xff]  ;;  %v51_v4 = vld [vmem:[%s1782_s1 + $0x10] sm:$0xff]  ;;  %v52_v5 = vld [vmem:[%s1782_s1 + $0x18] sm:$0xff] }
   0x3   :  { %1117 = vmatpush.msra.mxu3 %v55_v0  ;;  %1121 = vmatpush.msra.mxu2 %v56_v1  ;;  %v49_v6 = vld [vmem:[%s1782_s1] sm:$0xff]  ;;  %v50_v7 = vld [vmem:[%s1782_s1 + $0x8] sm:$0xff] }
   0x4   :  { %119 = vmatpush.msra.mxu0 %v53_v2  ;;  %184 = vmatpush.msra.mxu1 %v54_v3  ;;  %v33_v8 = vld [vmem:[%s1781_s0] sm:$0xff] }
   0x5   :  { %1118 = vmatpush.msra.mxu3 %v53_v2  ;;  %1122 = vmatpush.msra.mxu2 %v54_v3 }
   0x6   :  { %120 = vmatpush.msra.mxu0 %v51_v4  ;;  %185 = vmatpush.msra.mxu1 %v52_v5 }
   0x7   :  { %1119 = vmatpush.msra.mxu3 %v51_v4  ;;  %1123 = vmatpush.msra.mxu2 %v52_v5 }
   0x8   :  { %121 = vmatpush.msra.mxu0 %v49_v6  ;;  %186 = vmatpush.msra.mxu1 %v50_v7 }
   0x9   :  { %14 = vsyncpa [#allocation3], 0  ;;  %1051 = vmatmul.msk.f32.vlgmr.msra.gmra.mxu0 %vm57_vm0, %v33_v8  ;;  %1067 = vmatmul.msk.f32.vlgmr.msra.gmra.mxu1 %vm57_vm0, %v33_v8  ;;  %v34_v9 = vld [vmem:[%s1781_s0 + $0x8] sm:$0xff]  ;;  %v35_v10 = vld [vmem:[%s1781_s0 + $0x10] sm:$0xff]  ;;  %vm807_vm1 = vcmask 523264   ;;  %s1167_s21 = smov [#allocation2]  }
   0xa   :  { %1120 = vmatpush.msra.mxu3 %v49_v6  ;;  %1124 = vmatpush.msra.mxu2 %v50_v7  ;;  %v36_v11 = vld [vmem:[%s1781_s0 + $0x18] sm:$0xff]  ;;  %v37_v12 = vld [vmem:[%s1781_s0 + $0x20] sm:$0xff]  ;;  %v42_v13 = vld [vmem:[%s1781_s0 + $0x48] sm:$0xff]  ;;  %s1042_s23 = sshll.u32 %s1790_s9, 4  ;;  %s1043_s23 = int_to_ptr.hbm [resolvable:$true] %s1042_s23 }
   0xb   :  { %1060 = vmatmul.msk.f32.vlgmr.msra.gmra.mxu3 %vm57_vm0, %v42_v13  ;;  %1076 = vmatmul.msk.f32.vlgmr.msra.gmra.mxu2 %vm57_vm0, %v42_v13  ;;  %v416_v14 = vld [vmem:[%s1784_s3 + $0xf0] sm:$0xff]  ;;  %v417_v15 = vld [vmem:[%s1784_s3 + $0xf8] sm:$0xff]  ;;  %v38_v16 = vld [vmem:[%s1781_s0 + $0x28] sm:$0xff] }
   0xc   :  { %418 = vmatpush.msrb.mxu2 %v416_v14  ;;  %483 = vmatpush.msrb.mxu3 %v417_v15  ;;  %v43_v17 = vld [vmem:[%s1781_s0 + $0x50] sm:$0xff]  ;;  %v414_v18 = vld [vmem:[%s1784_s3 + $0xe0] sm:$0xff]  ;;  %v415_v19 = vld [vmem:[%s1784_s3 + $0xe8] sm:$0xff] }
   0xd   :  { %v412_v20 = vld [vmem:[%s1784_s3 + $0xd0] sm:$0xff]  ;;  %v413_v21 = vld [vmem:[%s1784_s3 + $0xd8] sm:$0xff]  ;;  %v410_v22 = vld [vmem:[%s1784_s3 + $0xc0] sm:$0xff] }
   0xe   :  { %419 = vmatpush.msrb.mxu2 %v414_v18  ;;  %484 = vmatpush.msrb.mxu3 %v415_v19  ;;  %v411_v23 = vld [vmem:[%s1784_s3 + $0xc8] sm:$0xff]  ;;  %v39_v24 = vld [vmem:[%s1781_s0 + $0x30] sm:$0xff]  ;;  %v44_v25 = vld [vmem:[%s1781_s0 + $0x58] sm:$0xff] }
   0xf   :  { %v408_v26 = vld [vmem:[%s1784_s3 + $0xb0] sm:$0xff]  ;;  %v409_v27 = vld [vmem:[%s1784_s3 + $0xb8] sm:$0xff]  ;;  %v406_v28 = vld [vmem:[%s1784_s3 + $0xa0] sm:$0xff] }
  0x10   :  { %420 = vmatpush.msrb.mxu2 %v412_v20  ;;  %485 = vmatpush.msrb.mxu3 %v413_v21  ;;  %v407_v29 = vld [vmem:[%s1784_s3 + $0xa8] sm:$0xff]  ;;  %v404_v30 = vld [vmem:[%s1784_s3 + $0x90] sm:$0xff]  ;;  %v405_v31 = vld [vmem:[%s1784_s3 + $0x98] sm:$0xff] }
  0x11   :  { %1052 = vmatmul.msk.f32.gmra.mxu0 %vm57_vm0, %v34_v9  ;;  %1068 = vmatmul.msk.f32.gmra.mxu1 %vm57_vm0, %v34_v9  ;;  %v40_v32 = vld [vmem:[%s1781_s0 + $0x38] sm:$0xff]  ;;  %v45_v33 = vld [vmem:[%s1781_s0 + $0x60] sm:$0xff]  ;;  %v403_v35 = vld [vmem:[%s1784_s3 + $0x88] sm:$0xff] }
  0x12   :  { %421 = vmatpush.msrb.mxu2 %v410_v22  ;;  %486 = vmatpush.msrb.mxu3 %v411_v23  ;;  %v402_v34 = vld [vmem:[%s1784_s3 + $0x80] sm:$0xff]  ;;  %v400_v36 = vld [vmem:[%s1784_s3 + $0x70] sm:$0xff]  ;;  %v401_v37 = vld [vmem:[%s1784_s3 + $0x78] sm:$0xff] }
  0x13   :  { %1061 = vmatmul.msk.f32.gmra.mxu3 %vm57_vm0, %v43_v17  ;;  %1077 = vmatmul.msk.f32.gmra.mxu2 %vm57_vm0, %v43_v17  ;;  %v398_v38 = vld [vmem:[%s1784_s3 + $0x60] sm:$0xff]  ;;  %v399_v39 = vld [vmem:[%s1784_s3 + $0x68] sm:$0xff]  ;;  %v47_v42 = vld [vmem:[%s1781_s0 + $0x70] sm:$0xff] }
  0x14   :  { %422 = vmatpush.msrb.mxu2 %v408_v26  ;;  %487 = vmatpush.msrb.mxu3 %v409_v27  ;;  %v41_v40 = vld [vmem:[%s1781_s0 + $0x40] sm:$0xff]  ;;  %v46_v41 = vld [vmem:[%s1781_s0 + $0x68] sm:$0xff]  ;;  %v48_v43 = vld [vmem:[%s1781_s0 + $0x78] sm:$0xff] }
  0x15   :  { %v396_v44 = vld [vmem:[%s1784_s3 + $0x50] sm:$0xff]  ;;  %v397_v45 = vld [vmem:[%s1784_s3 + $0x58] sm:$0xff]  ;;  %v394_v46 = vld [vmem:[%s1784_s3 + $0x40] sm:$0xff] }
  0x16   :  { %423 = vmatpush.msrb.mxu2 %v406_v28  ;;  %488 = vmatpush.msrb.mxu3 %v407_v29  ;;  %v395_v47 = vld [vmem:[%s1784_s3 + $0x48] sm:$0xff]  ;;  %v392_v48 = vld [vmem:[%s1784_s3 + $0x30] sm:$0xff]  ;;  %v393_v49 = vld [vmem:[%s1784_s3 + $0x38] sm:$0xff] }
  0x17   :  { %v390_v50 = vld [vmem:[%s1784_s3 + $0x20] sm:$0xff]  ;;  %v391_v51 = vld [vmem:[%s1784_s3 + $0x28] sm:$0xff]  ;;  %v388_v52 = vld [vmem:[%s1784_s3 + $0x10] sm:$0xff] }
  0x18   :  { %424 = vmatpush.msrb.mxu2 %v404_v30  ;;  %489 = vmatpush.msrb.mxu3 %v405_v31  ;;  %v389_v53 = vld [vmem:[%s1784_s3 + $0x18] sm:$0xff]  ;;  %v386_v54 = vld [vmem:[%s1784_s3] sm:$0xff]  ;;  %v387_v55 = vld [vmem:[%s1784_s3 + $0x8] sm:$0xff] }
  0x19   :  { %1053 = vmatmul.msk.f32.gmra.mxu0 %vm57_vm0, %v35_v10  ;;  %1069 = vmatmul.msk.f32.gmra.mxu1 %vm57_vm0, %v35_v10  ;;  %v1421_v56 = vld [vmem:[%s1783_s2] ss:$0 sm:$0xff]  ;;  %v1427_v60 = vld [vmem:[%s1783_s2 + $0x1] ss:$0 sm:$0xff]  ;;  %v1433_v0 = vld [vmem:[%s1783_s2 + $0x2] ss:$0 sm:$0xff] }
  0x1a   :  { %425 = vmatpush.msrb.mxu2 %v402_v34  ;;  %490 = vmatpush.msrb.mxu3 %v403_v35 }
  0x1b   :  { %1062 = vmatmul.msk.f32.gmra.mxu3 %vm57_vm0, %v44_v25  ;;  %1078 = vmatmul.msk.f32.gmra.mxu2 %vm57_vm0, %v44_v25 }
  0x1c   :  { %426 = vmatpush.msrb.mxu2 %v400_v36  ;;  %491 = vmatpush.msrb.mxu3 %v401_v37 }
  0x1e   :  { %427 = vmatpush.msrb.mxu2 %v398_v38  ;;  %492 = vmatpush.msrb.mxu3 %v399_v39 }
  0x20   :  { %428 = vmatpush.msrb.mxu2 %v396_v44  ;;  %493 = vmatpush.msrb.mxu3 %v397_v45 }
  0x21   :  { %1054 = vmatmul.msk.f32.gmra.mxu0 %vm57_vm0, %v36_v11  ;;  %1070 = vmatmul.msk.f32.gmra.mxu1 %vm57_vm0, %v36_v11 }
  0x22   :  { %429 = vmatpush.msrb.mxu2 %v394_v46  ;;  %494 = vmatpush.msrb.mxu3 %v395_v47 }
  0x23   :  { %1063 = vmatmul.msk.f32.gmra.mxu3 %vm57_vm0, %v45_v33  ;;  %1079 = vmatmul.msk.f32.gmra.mxu2 %vm57_vm0, %v45_v33 }
  0x24   :  { %430 = vmatpush.msrb.mxu2 %v392_v48  ;;  %495 = vmatpush.msrb.mxu3 %v393_v49 }
  0x26   :  { %431 = vmatpush.msrb.mxu2 %v390_v50  ;;  %496 = vmatpush.msrb.mxu3 %v391_v51 }
  0x28   :  { %432 = vmatpush.msrb.mxu2 %v388_v52  ;;  %497 = vmatpush.msrb.mxu3 %v389_v53 }
  0x29   :  { %1055 = vmatmul.msk.f32.gmra.mxu0 %vm57_vm0, %v37_v12  ;;  %1071 = vmatmul.msk.f32.gmra.mxu1 %vm57_vm0, %v37_v12 }
  0x2a   :  { %433 = vmatpush.msrb.mxu2 %v386_v54  ;;  %498 = vmatpush.msrb.mxu3 %v387_v55 }
  0x2b   :  { %1064 = vmatmul.msk.f32.gmra.mxu3 %vm57_vm0, %v46_v41  ;;  %1080 = vmatmul.msk.f32.gmra.mxu2 %vm57_vm0, %v46_v41 }
  0x31   :  { %1056 = vmatmul.msk.f32.gmra.mxu0 %vm57_vm0, %v38_v16  ;;  %1072 = vmatmul.msk.f32.gmra.mxu1 %vm57_vm0, %v38_v16 }
  0x33   :  { %1065 = vmatmul.msk.f32.gmra.mxu3 %vm57_vm0, %v47_v42  ;;  %1081 = vmatmul.msk.f32.gmra.mxu2 %vm57_vm0, %v47_v42 }
  0x39   :  { %1057 = vmatmul.msk.f32.gmra.mxu0 %vm57_vm0, %v39_v24  ;;  %1073 = vmatmul.msk.f32.gmra.mxu1 %vm57_vm0, %v39_v24 }
  0x3b   :  { %1066 = vmatmul.msk.f32.gmra.mxu3 %vm57_vm0, %v48_v43  ;;  %1082 = vmatmul.msk.f32.gmra.mxu2 %vm57_vm0, %v48_v43 }
  0x41   :  { %1058 = vmatmul.msk.f32.gmra.mxu0 %vm57_vm0, %v40_v32  ;;  %1074 = vmatmul.msk.f32.gmra.mxu1 %vm57_vm0, %v40_v32 }
  0x49   :  { %1059 = vmatmul.msk.f32.gmra.mxu0 %vm57_vm0, %v41_v40  ;;  %1075 = vmatmul.msk.f32.gmra.mxu1 %vm57_vm0, %v41_v40 }
  0x86   :  { %v123_v57 = vpop.f32.mrf.mxu0  ;;  %v188_v58 = vpop.f32.mrf.mxu1 }
  0x87   :  { %v240_v59 = vadd.f32 %v1421_v56, %v123_v57  ;;  %v306_v61 = vadd.f32 %v1421_v56, %v188_v58 }
  0x89   :  { %v256_v62 = vmax.f32 %v240_v59, 0.0  ;;  %v322_v63 = vmax.f32 %v306_v61, 0.0 }
  0x8b   :  { %v273_v1 = vmul.f32 %v1427_v60, %v256_v62  ;;  %v338_v2 = vmul.f32 %v1427_v60, %v322_v63 }
  0x8d   :  { %v290_v3 = vadd.f32 %v1433_v0, %v273_v1  ;;  %v354_v4 = vadd.f32 %v1433_v0, %v338_v2 }
  0x8e   :  { %v126_v5 = vpop.f32.mrf.mxu0  ;;  %v191_v6 = vpop.f32.mrf.mxu1 }
  0x8f   :  { %v241_v7 = vadd.f32 %v1421_v56, %v126_v5  ;;  %v307_v8 = vadd.f32 %v1421_v56, %v191_v6  ;;  %v370_v9 = vmax.f32 %v290_v3, %v354_v4  ;;  %v150_v62 = vpop.f32.mrf.mxu3  ;;  %v215_v63 = vpop.f32.mrf.mxu2 }
  0x91   :  { %v257_v10 = vmax.f32 %v241_v7, 0.0  ;;  %v323_v11 = vmax.f32 %v307_v8, 0.0  ;;  %434 = vmatmul.f32.vlgmr.msrb.gmra.mxu2 %v370_v9  ;;  %499 = vmatmul.f32.vlgmr.msrb.gmra.mxu3 %v370_v9 }
  0x93   :  { %v274_v12 = vmul.f32 %v1427_v60, %v257_v10  ;;  %v339_v13 = vmul.f32 %v1427_v60, %v323_v11 }
  0x95   :  { %v291_v14 = vadd.f32 %v1433_v0, %v274_v12  ;;  %v355_v15 = vadd.f32 %v1433_v0, %v339_v13 }
  0x96   :  { %v129_v16 = vpop.f32.mrf.mxu0  ;;  %v194_v17 = vpop.f32.mrf.mxu1 }
  0x97   :  { %v242_v18 = vadd.f32 %v1421_v56, %v129_v16  ;;  %v308_v19 = vadd.f32 %v1421_v56, %v194_v17  ;;  %v371_v20 = vmax.f32 %v291_v14, %v355_v15  ;;  %v153_v17 = vpop.f32.mrf.mxu3 }
  0x99   :  { %v258_v21 = vmax.f32 %v242_v18, 0.0  ;;  %v324_v22 = vmax.f32 %v308_v19, 0.0  ;;  %437 = vmatmul.f32.gmra.mxu2 %v371_v20  ;;  %502 = vmatmul.f32.gmra.mxu3 %v371_v20  ;;  %v218_v18 = vpop.f32.mrf.mxu2 }
  0x9b   :  { %v275_v23 = vmul.f32 %v1427_v60, %v258_v21  ;;  %v340_v24 = vmul.f32 %v1427_v60, %v324_v22 }
  0x9d   :  { %v292_v25 = vadd.f32 %v1433_v0, %v275_v23  ;;  %v356_v26 = vadd.f32 %v1433_v0, %v340_v24 }
  0x9e   :  { %v132_v27 = vpop.f32.mrf.mxu0  ;;  %v197_v28 = vpop.f32.mrf.mxu1 }
  0x9f   :  { %v243_v29 = vadd.f32 %v1421_v56, %v132_v27  ;;  %v309_v30 = vadd.f32 %v1421_v56, %v197_v28  ;;  %v372_v31 = vmax.f32 %v292_v25, %v356_v26  ;;  %v249_v25 = vadd.f32 %v1421_v56, %v150_v62 }
  0xa0   :  { %v315_v26 = vadd.f32 %v1421_v56, %v215_v63 }
  0xa1   :  { %v259_v32 = vmax.f32 %v243_v29, 0.0  ;;  %v325_v33 = vmax.f32 %v309_v30, 0.0  ;;  %440 = vmatmul.f32.gmra.mxu2 %v372_v31  ;;  %505 = vmatmul.f32.gmra.mxu3 %v372_v31 }
  0xa3   :  { %v276_v34 = vmul.f32 %v1427_v60, %v259_v32  ;;  %v341_v35 = vmul.f32 %v1427_v60, %v325_v33 }
  0xa5   :  { %v293_v36 = vadd.f32 %v1433_v0, %v276_v34  ;;  %v357_v37 = vadd.f32 %v1433_v0, %v341_v35  ;;  %v265_v34 = vmax.f32 %v249_v25, 0.0  ;;  %v331_v35 = vmax.f32 %v315_v26, 0.0 }
  0xa6   :  { %v135_v38 = vpop.f32.mrf.mxu0  ;;  %v200_v39 = vpop.f32.mrf.mxu1 }
  0xa7   :  { %v244_v40 = vadd.f32 %v1421_v56, %v135_v38  ;;  %v310_v41 = vadd.f32 %v1421_v56, %v200_v39  ;;  %v373_v42 = vmax.f32 %v293_v36, %v357_v37  ;;  %v156_v36 = vpop.f32.mrf.mxu3  ;;  %v221_v37 = vpop.f32.mrf.mxu2 }
  0xa9   :  { %v260_v43 = vmax.f32 %v244_v40, 0.0  ;;  %v326_v44 = vmax.f32 %v310_v41, 0.0  ;;  %443 = vmatmul.f32.gmra.mxu2 %v373_v42  ;;  %508 = vmatmul.f32.gmra.mxu3 %v373_v42  ;;  %v250_v40 = vadd.f32 %v1421_v56, %v153_v17  ;;  %v316_v41 = vadd.f32 %v1421_v56, %v218_v18 }
  0xaa   :  { %v282_v42 = vmul.f32 %v1427_v60, %v265_v34 }
  0xab   :  { %v277_v45 = vmul.f32 %v1427_v60, %v260_v43  ;;  %v342_v46 = vmul.f32 %v1427_v60, %v326_v44  ;;  %v347_v43 = vmul.f32 %v1427_v60, %v331_v35 }
  0xad   :  { %v294_v47 = vadd.f32 %v1433_v0, %v277_v45  ;;  %v358_v48 = vadd.f32 %v1433_v0, %v342_v46 }
  0xae   :  { %v138_v49 = vpop.f32.mrf.mxu0  ;;  %v203_v50 = vpop.f32.mrf.mxu1 }
  0xaf   :  { %v245_v51 = vadd.f32 %v1421_v56, %v138_v49  ;;  %v311_v52 = vadd.f32 %v1421_v56, %v203_v50  ;;  %v374_v53 = vmax.f32 %v294_v47, %v358_v48  ;;  %v266_v47 = vmax.f32 %v250_v40, 0.0 }
  0xb0   :  { %v332_v48 = vmax.f32 %v316_v41, 0.0  ;;  %v299_v49 = vadd.f32 %v1433_v0, %v282_v42  ;;  %v363_v50 = vadd.f32 %v1433_v0, %v347_v43 }
  0xb1   :  { %v261_v54 = vmax.f32 %v245_v51, 0.0  ;;  %v327_v55 = vmax.f32 %v311_v52, 0.0  ;;  %446 = vmatmul.f32.gmra.mxu2 %v374_v53  ;;  %511 = vmatmul.f32.gmra.mxu3 %v374_v53  ;;  %v283_v51 = vmul.f32 %v1427_v60, %v266_v47  ;;  %v159_v53 = vpop.f32.mrf.mxu3 }
  0xb2   :  { %v348_v52 = vmul.f32 %v1427_v60, %v332_v48 }
  0xb3   :  { %v278_v57 = vmul.f32 %v1427_v60, %v261_v54  ;;  %v343_v58 = vmul.f32 %v1427_v60, %v327_v55  ;;  %v224_v54 = vpop.f32.mrf.mxu2  ;;  %v379_v55 = vmax.f32 %v299_v49, %v363_v50  ;;  %v702_v50 = vld [vmem:[%s1786_s5 + $0x20] sm:$0xff] }
  0xb5   :  { %v295_v59 = vadd.f32 %v1433_v0, %v278_v57  ;;  %v359_v61 = vadd.f32 %v1433_v0, %v343_v58  ;;  %v251_v57 = vadd.f32 %v1421_v56, %v156_v36  ;;  %v317_v58 = vadd.f32 %v1421_v56, %v221_v37  ;;  %v705_v36 = vld [vmem:[%s1786_s5 + $0x38] sm:$0xff]  ;;  %v704_v37 = vld [vmem:[%s1786_s5 + $0x30] sm:$0xff] }
  0xb6   :  { %v141_v1 = vpop.f32.mrf.mxu0  ;;  %v206_v2 = vpop.f32.mrf.mxu1 }
  0xb7   :  { %v246_v3 = vadd.f32 %v1421_v56, %v141_v1  ;;  %v312_v4 = vadd.f32 %v1421_v56, %v206_v2  ;;  %v375_v5 = vmax.f32 %v295_v59, %v359_v61  ;;  %v300_v59 = vadd.f32 %v1433_v0, %v283_v51  ;;  %v713_v1 = vld [vmem:[%s1786_s5 + $0x78] sm:$0xff] }
  0xb8   :  { %v364_v61 = vadd.f32 %v1433_v0, %v348_v52  ;;  %v267_v62 = vmax.f32 %v251_v57, 0.0  ;;  %v333_v63 = vmax.f32 %v317_v58, 0.0  ;;  %716 = vmatpush.msrb.mxu0 %v713_v1  ;;  %v701_v51 = vld [vmem:[%s1786_s5 + $0x18] sm:$0xff]  ;;  %v699_v57 = vld [vmem:[%s1786_s5 + $0x8] sm:$0xff] }
  0xb9   :  { %v262_v6 = vmax.f32 %v246_v3, 0.0  ;;  %v328_v7 = vmax.f32 %v312_v4, 0.0  ;;  %449 = vmatmul.f32.gmra.mxu2 %v375_v5  ;;  %514 = vmatmul.f32.gmra.mxu3 %v375_v5  ;;  %v252_v5 = vadd.f32 %v1421_v56, %v159_v53 }
  0xba   :  { %v380_v2 = vmax.f32 %v300_v59, %v364_v61  ;;  %v284_v3 = vmul.f32 %v1427_v60, %v267_v62  ;;  %v349_v4 = vmul.f32 %v1427_v60, %v333_v63  ;;  %v698_v62 = vld [vmem:[%s1786_s5] sm:$0xff] }
  0xbb   :  { %v279_v8 = vmul.f32 %v1427_v60, %v262_v6  ;;  %v344_v9 = vmul.f32 %v1427_v60, %v328_v7  ;;  %v318_v6 = vadd.f32 %v1421_v56, %v224_v54  ;;  %v162_v7 = vpop.f32.mrf.mxu3 }
  0xbd   :  { %v296_v10 = vadd.f32 %v1433_v0, %v279_v8  ;;  %v360_v11 = vadd.f32 %v1433_v0, %v344_v9  ;;  %v227_v8 = vpop.f32.mrf.mxu2  ;;  %v268_v9 = vmax.f32 %v252_v5, 0.0 }
  0xbe   :  { %v144_v12 = vpop.f32.mrf.mxu0  ;;  %v209_v13 = vpop.f32.mrf.mxu1  ;;  %v319_v17 = vadd.f32 %v1421_v56, %v227_v8  ;;  %v1592_v8 = vld [vmem:[%s1785_s4 + $0x2] ss:$0 sm:$0xff] }
  0xbf   :  { %v247_v14 = vadd.f32 %v1421_v56, %v144_v12  ;;  %v313_v15 = vadd.f32 %v1421_v56, %v209_v13  ;;  %v376_v16 = vmax.f32 %v296_v10, %v360_v11  ;;  %v334_v10 = vmax.f32 %v318_v6, 0.0  ;;  %v712_v13 = vld [vmem:[%s1786_s5 + $0x70] sm:$0xff]  ;;  %v1586_v6 = vld [vmem:[%s1785_s4 + $0x1] ss:$0 sm:$0xff] }
  0xc0   :  { %v301_v11 = vadd.f32 %v1433_v0, %v284_v3  ;;  %v365_v12 = vadd.f32 %v1433_v0, %v349_v4  ;;  %717 = vmatpush.msrb.mxu0 %v712_v13  ;;  %v285_v18 = vmul.f32 %v1427_v60, %v268_v9  ;;  %v1580_v3 = vld [vmem:[%s1785_s4] ss:$0 sm:$0xff] }
  0xc1   :  { %v263_v19 = vmax.f32 %v247_v14, 0.0  ;;  %v329_v20 = vmax.f32 %v313_v15, 0.0  ;;  %452 = vmatmul.f32.gmra.mxu2 %v376_v16  ;;  %517 = vmatmul.f32.gmra.mxu3 %v376_v16  ;;  %v711_v14 = vld [vmem:[%s1786_s5 + $0x68] sm:$0xff]  ;;  %v710_v15 = vld [vmem:[%s1786_s5 + $0x60] sm:$0xff]  ;;  %v253_v16 = vadd.f32 %v1421_v56, %v162_v7 }
  0xc2   :  { %718 = vmatpush.msrb.mxu0 %v711_v14  ;;  %v302_v26 = vadd.f32 %v1433_v0, %v285_v18 }
  0xc3   :  { %v280_v21 = vmul.f32 %v1427_v60, %v263_v19  ;;  %v345_v22 = vmul.f32 %v1427_v60, %v329_v20  ;;  %v350_v19 = vmul.f32 %v1427_v60, %v334_v10  ;;  %v381_v20 = vmax.f32 %v301_v11, %v365_v12 }
  0xc4   :  { %719 = vmatpush.msrb.mxu0 %v710_v15 }
  0xc5   :  { %v297_v23 = vadd.f32 %v1433_v0, %v280_v21  ;;  %v361_v24 = vadd.f32 %v1433_v0, %v345_v22  ;;  %v709_v21 = vld [vmem:[%s1786_s5 + $0x58] sm:$0xff]  ;;  %v269_v22 = vmax.f32 %v253_v16, 0.0  ;;  %v230_v25 = vpop.f32.mrf.mxu2 }
  0xc6   :  { %v147_v27 = vpop.f32.mrf.mxu0  ;;  %v212_v28 = vpop.f32.mrf.mxu1  ;;  %720 = vmatpush.msrb.mxu0 %v709_v21  ;;  %v320_v35 = vadd.f32 %v1421_v56, %v230_v25 }
  0xc7   :  { %v248_v29 = vadd.f32 %v1421_v56, %v147_v27  ;;  %v314_v30 = vadd.f32 %v1421_v56, %v212_v28  ;;  %v377_v31 = vmax.f32 %v297_v23, %v361_v24  ;;  %v335_v23 = vmax.f32 %v319_v17, 0.0  ;;  %v165_v24 = vpop.f32.mrf.mxu3  ;;  %v708_v28 = vld [vmem:[%s1786_s5 + $0x50] sm:$0xff] }
  0xc8   :  { %v366_v27 = vadd.f32 %v1433_v0, %v350_v19  ;;  %721 = vmatpush.msrb.mxu0 %v708_v28  ;;  %v254_v34 = vadd.f32 %v1421_v56, %v165_v24  ;;  %v336_v41 = vmax.f32 %v320_v35, 0.0 }
  0xc9   :  { %v264_v32 = vmax.f32 %v248_v29, 0.0  ;;  %v330_v33 = vmax.f32 %v314_v30, 0.0  ;;  %455 = vmatmul.f32.gmra.mxu2 %v377_v31  ;;  %520 = vmatmul.f32.gmra.mxu3 %v377_v31  ;;  %v707_v29 = vld [vmem:[%s1786_s5 + $0x48] sm:$0xff]  ;;  %v706_v30 = vld [vmem:[%s1786_s5 + $0x40] sm:$0xff]  ;;  %v286_v31 = vmul.f32 %v1427_v60, %v269_v22 }
  0xca   :  { %722 = vmatpush.msrb.mxu0 %v707_v29  ;;  %v270_v40 = vmax.f32 %v254_v34, 0.0  ;;  %v352_v47 = vmul.f32 %v1427_v60, %v336_v41 }
  0xcb   :  { %v281_v38 = vmul.f32 %v1427_v60, %v264_v32  ;;  %v346_v39 = vmul.f32 %v1427_v60, %v330_v33  ;;  %v351_v32 = vmul.f32 %v1427_v60, %v335_v23  ;;  %v382_v33 = vmax.f32 %v302_v26, %v366_v27 }
  0xcc   :  { %723 = vmatpush.msrb.mxu0 %v706_v30 }
  0xcd   :  { %v298_v44 = vadd.f32 %v1433_v0, %v281_v38  ;;  %v362_v45 = vadd.f32 %v1433_v0, %v346_v39  ;;  %v303_v38 = vadd.f32 %v1433_v0, %v286_v31  ;;  %v367_v39 = vadd.f32 %v1433_v0, %v351_v32  ;;  %v233_v43 = vpop.f32.mrf.mxu2 }
  0xce   :  { %724 = vmatpush.msrb.mxu0 %v705_v36  ;;  %v321_v49 = vadd.f32 %v1421_v56, %v233_v43 }
  0xcf   :  { %v378_v46 = vmax.f32 %v298_v44, %v362_v45  ;;  %v168_v42 = vpop.f32.mrf.mxu3  ;;  %v703_v44 = vld [vmem:[%s1786_s5 + $0x28] sm:$0xff]  ;;  %v383_v45 = vmax.f32 %v303_v38, %v367_v39 }
  0xd0   :  { %725 = vmatpush.msrb.mxu0 %v704_v37  ;;  %v255_v48 = vadd.f32 %v1421_v56, %v168_v42  ;;  %v337_v53 = vmax.f32 %v321_v49, 0.0  ;;  %v700_v56 = vld [vmem:[%s1786_s5 + $0x10] sm:$0xff]  ;;  %s1040_s5 = sshll.u32 %s1167_s21, 4  ;;  %s1041_s5 = int_to_ptr.vmem [resolvable:$true] %s1040_s5 }
  0xd1   :  { %458 = vmatmul.f32.gmra.mxu2 %v378_v46  ;;  %523 = vmatmul.f32.gmra.mxu3 %v378_v46  ;;  %v287_v46 = vmul.f32 %v1427_v60, %v270_v40 }
  0xd2   :  { %726 = vmatpush.msrb.mxu0 %v703_v44  ;;  %v271_v52 = vmax.f32 %v255_v48, 0.0  ;;  %v353_v59 = vmul.f32 %v1427_v60, %v337_v53 }
  0xd3   :  { %v304_v54 = vadd.f32 %v1433_v0, %v287_v46 }
  0xd4   :  { %727 = vmatpush.msrb.mxu0 %v702_v50  ;;  %v288_v58 = vmul.f32 %v1427_v60, %v271_v52  ;;  %v369_v1 = vadd.f32 %v1433_v0, %v353_v59 }
  0xd6   :  { %728 = vmatpush.msrb.mxu0 %v701_v51  ;;  %v305_v63 = vadd.f32 %v1433_v0, %v288_v58 }
  0xd8   :  { %729 = vmatpush.msrb.mxu0 %v700_v56 }
  0xd9   :  { %461 = vmatmul.f32.gmra.mxu2 %v379_v55  ;;  %526 = vmatmul.f32.gmra.mxu3 %v379_v55  ;;  %v368_v55 = vadd.f32 %v1433_v0, %v352_v47 }
  0xda   :  { %730 = vmatpush.msrb.mxu0 %v699_v57 }
  0xdb   :  { %v384_v61 = vmax.f32 %v304_v54, %v368_v55 }
  0xdc   :  { %731 = vmatpush.msrb.mxu0 %v698_v62 }
  0xe1   :  { %464 = vmatmul.f32.gmra.mxu2 %v380_v2  ;;  %529 = vmatmul.f32.gmra.mxu3 %v380_v2  ;;  %v385_v2 = vmax.f32 %v305_v63, %v369_v1 }
  0xe9   :  { %467 = vmatmul.f32.gmra.mxu2 %v381_v20  ;;  %532 = vmatmul.f32.gmra.mxu3 %v381_v20 }
  0xf1   :  { %470 = vmatmul.f32.gmra.mxu2 %v382_v33  ;;  %535 = vmatmul.f32.gmra.mxu3 %v382_v33 }
  0xf9   :  { %473 = vmatmul.f32.gmra.mxu2 %v383_v45  ;;  %538 = vmatmul.f32.gmra.mxu3 %v383_v45 }
 0x101   :  { %476 = vmatmul.f32.gmra.mxu2 %v384_v61  ;;  %541 = vmatmul.f32.gmra.mxu3 %v384_v61 }
 0x109   :  { %479 = vmatmul.f32.gmra.mxu2 %v385_v2  ;;  %544 = vmatmul.f32.gmra.mxu3 %v385_v2 }
 0x114   :  { %v435_v60 = vpop.f32.mrf.mxu2  ;;  %v500_v4 = vpop.f32.mrf.mxu3 }
 0x115   :  { %v552_v5 = vadd.f32 %v1580_v3, %v435_v60  ;;  %v618_v7 = vadd.f32 %v1580_v3, %v500_v4 }
 0x117   :  { %v568_v0 = vmax.f32 %v552_v5, 0.0  ;;  %v634_v9 = vmax.f32 %v618_v7, 0.0 }
 0x119   :  { %v585_v10 = vmul.f32 %v1586_v6, %v568_v0  ;;  %v650_v11 = vmul.f32 %v1586_v6, %v634_v9 }
 0x11b   :  { %v602_v12 = vadd.f32 %v1592_v8, %v585_v10  ;;  %v666_v13 = vadd.f32 %v1592_v8, %v650_v11 }
 0x11c   :  { %v438_v14 = vpop.f32.mrf.mxu2  ;;  %v503_v15 = vpop.f32.mrf.mxu3 }
 0x11d   :  { %v553_v16 = vadd.f32 %v1580_v3, %v438_v14  ;;  %v619_v17 = vadd.f32 %v1580_v3, %v503_v15  ;;  %v682_v18 = vmax.f32 %v602_v12, %v666_v13 }
 0x11f   :  { %v569_v19 = vmax.f32 %v553_v16, 0.0  ;;  %v635_v20 = vmax.f32 %v619_v17, 0.0  ;;  %732 = vmatmul.f32.vlgmr.msrb.gmra.mxu0 %v682_v18 }
 0x121   :  { %v586_v21 = vmul.f32 %v1586_v6, %v569_v19  ;;  %v651_v22 = vmul.f32 %v1586_v6, %v635_v20 }
 0x123   :  { %v603_v23 = vadd.f32 %v1592_v8, %v586_v21  ;;  %v667_v24 = vadd.f32 %v1592_v8, %v651_v22 }
 0x124   :  { %v441_v25 = vpop.f32.mrf.mxu2  ;;  %v506_v26 = vpop.f32.mrf.mxu3 }
 0x125   :  { %v554_v27 = vadd.f32 %v1580_v3, %v441_v25  ;;  %v620_v28 = vadd.f32 %v1580_v3, %v506_v26  ;;  %v683_v29 = vmax.f32 %v603_v23, %v667_v24 }
 0x127   :  { %v570_v30 = vmax.f32 %v554_v27, 0.0  ;;  %v636_v31 = vmax.f32 %v620_v28, 0.0  ;;  %735 = vmatmul.f32.gmra.mxu0 %v683_v29 }
 0x129   :  { %v587_v32 = vmul.f32 %v1586_v6, %v570_v30  ;;  %v652_v33 = vmul.f32 %v1586_v6, %v636_v31 }
 0x12b   :  { %v604_v34 = vadd.f32 %v1592_v8, %v587_v32  ;;  %v668_v35 = vadd.f32 %v1592_v8, %v652_v33 }
 0x12c   :  { %v444_v36 = vpop.f32.mrf.mxu2  ;;  %v509_v37 = vpop.f32.mrf.mxu3 }
 0x12d   :  { %v555_v38 = vadd.f32 %v1580_v3, %v444_v36  ;;  %v621_v39 = vadd.f32 %v1580_v3, %v509_v37  ;;  %v684_v40 = vmax.f32 %v604_v34, %v668_v35 }
 0x12f   :  { %v571_v41 = vmax.f32 %v555_v38, 0.0  ;;  %v637_v42 = vmax.f32 %v621_v39, 0.0  ;;  %738 = vmatmul.f32.gmra.mxu0 %v684_v40 }
 0x131   :  { %v588_v43 = vmul.f32 %v1586_v6, %v571_v41  ;;  %v653_v44 = vmul.f32 %v1586_v6, %v637_v42 }
 0x133   :  { %v605_v45 = vadd.f32 %v1592_v8, %v588_v43  ;;  %v669_v46 = vadd.f32 %v1592_v8, %v653_v44 }
 0x134   :  { %v447_v47 = vpop.f32.mrf.mxu2  ;;  %v512_v48 = vpop.f32.mrf.mxu3 }
 0x135   :  { %v556_v49 = vadd.f32 %v1580_v3, %v447_v47  ;;  %v622_v50 = vadd.f32 %v1580_v3, %v512_v48  ;;  %v685_v51 = vmax.f32 %v605_v45, %v669_v46 }
 0x137   :  { %v572_v52 = vmax.f32 %v556_v49, 0.0  ;;  %v638_v53 = vmax.f32 %v622_v50, 0.0  ;;  %741 = vmatmul.f32.gmra.mxu0 %v685_v51 }
 0x139   :  { %v589_v54 = vmul.f32 %v1586_v6, %v572_v52  ;;  %v654_v55 = vmul.f32 %v1586_v6, %v638_v53 }
 0x13b   :  { %v606_v56 = vadd.f32 %v1592_v8, %v589_v54  ;;  %v670_v57 = vadd.f32 %v1592_v8, %v654_v55 }
 0x13c   :  { %v450_v58 = vpop.f32.mrf.mxu2  ;;  %v515_v59 = vpop.f32.mrf.mxu3 }
 0x13d   :  { %v557_v61 = vadd.f32 %v1580_v3, %v450_v58  ;;  %v623_v62 = vadd.f32 %v1580_v3, %v515_v59  ;;  %v686_v63 = vmax.f32 %v606_v56, %v670_v57 }
 0x13f   :  { %v573_v1 = vmax.f32 %v557_v61, 0.0  ;;  %v639_v2 = vmax.f32 %v623_v62, 0.0  ;;  %744 = vmatmul.f32.gmra.mxu0 %v686_v63 }
 0x141   :  { %v590_v60 = vmul.f32 %v1586_v6, %v573_v1  ;;  %v655_v4 = vmul.f32 %v1586_v6, %v639_v2 }
 0x143   :  { %v607_v5 = vadd.f32 %v1592_v8, %v590_v60  ;;  %v671_v7 = vadd.f32 %v1592_v8, %v655_v4 }
 0x144   :  { %v453_v0 = vpop.f32.mrf.mxu2  ;;  %v518_v9 = vpop.f32.mrf.mxu3 }
 0x145   :  { %v558_v10 = vadd.f32 %v1580_v3, %v453_v0  ;;  %v624_v11 = vadd.f32 %v1580_v3, %v518_v9  ;;  %v687_v12 = vmax.f32 %v607_v5, %v671_v7 }
 0x147   :  { %v574_v13 = vmax.f32 %v558_v10, 0.0  ;;  %v640_v14 = vmax.f32 %v624_v11, 0.0  ;;  %747 = vmatmul.f32.gmra.mxu0 %v687_v12  ;;  %v804_v11 = vld [vmem:[%s1787_s6 + $0x38] sm:$0xff] }
 0x148   :  { %864 = vmatpush.msrb.mxu1 %v804_v11 }
 0x149   :  { %v591_v15 = vmul.f32 %v1586_v6, %v574_v13  ;;  %v656_v16 = vmul.f32 %v1586_v6, %v640_v14  ;;  %v803_v14 = vld [vmem:[%s1787_s6 + $0x30] sm:$0xff] }
 0x14a   :  { %865 = vmatpush.msrb.mxu1 %v803_v14 }
 0x14b   :  { %v608_v17 = vadd.f32 %v1592_v8, %v591_v15  ;;  %v672_v18 = vadd.f32 %v1592_v8, %v656_v16  ;;  %v802_v15 = vld [vmem:[%s1787_s6 + $0x28] sm:$0xff] }
 0x14c   :  { %v456_v19 = vpop.f32.mrf.mxu2  ;;  %v521_v20 = vpop.f32.mrf.mxu3  ;;  %866 = vmatpush.msrb.mxu1 %v802_v15 }
 0x14d   :  { %v559_v21 = vadd.f32 %v1580_v3, %v456_v19  ;;  %v625_v22 = vadd.f32 %v1580_v3, %v521_v20  ;;  %v688_v23 = vmax.f32 %v608_v17, %v672_v18 }
 0x14f   :  { %v575_v24 = vmax.f32 %v559_v21, 0.0  ;;  %v641_v25 = vmax.f32 %v625_v22, 0.0  ;;  %750 = vmatmul.f32.gmra.mxu0 %v688_v23  ;;  %v801_v23 = vld [vmem:[%s1787_s6 + $0x20] sm:$0xff] }
 0x150   :  { %867 = vmatpush.msrb.mxu1 %v801_v23 }
 0x151   :  { %v592_v26 = vmul.f32 %v1586_v6, %v575_v24  ;;  %v657_v27 = vmul.f32 %v1586_v6, %v641_v25  ;;  %v800_v24 = vld [vmem:[%s1787_s6 + $0x18] sm:$0xff] }
 0x152   :  { %868 = vmatpush.msrb.mxu1 %v800_v24 }
 0x153   :  { %v609_v28 = vadd.f32 %v1592_v8, %v592_v26  ;;  %v673_v29 = vadd.f32 %v1592_v8, %v657_v27 }
 0x154   :  { %v459_v30 = vpop.f32.mrf.mxu2  ;;  %v524_v31 = vpop.f32.mrf.mxu3 }
 0x155   :  { %v560_v32 = vadd.f32 %v1580_v3, %v459_v30  ;;  %v626_v33 = vadd.f32 %v1580_v3, %v524_v31  ;;  %v689_v34 = vmax.f32 %v609_v28, %v673_v29  ;;  %v799_v29 = vld [vmem:[%s1787_s6 + $0x10] sm:$0xff] }
 0x156   :  { %869 = vmatpush.msrb.mxu1 %v799_v29 }
 0x157   :  { %v576_v35 = vmax.f32 %v560_v32, 0.0  ;;  %v642_v36 = vmax.f32 %v626_v33, 0.0  ;;  %753 = vmatmul.f32.gmra.mxu0 %v689_v34 }
 0x159   :  { %v593_v37 = vmul.f32 %v1586_v6, %v576_v35  ;;  %v658_v38 = vmul.f32 %v1586_v6, %v642_v36  ;;  %v798_v35 = vld [vmem:[%s1787_s6 + $0x8] sm:$0xff] }
 0x15a   :  { %870 = vmatpush.msrb.mxu1 %v798_v35 }
 0x15b   :  { %v610_v39 = vadd.f32 %v1592_v8, %v593_v37  ;;  %v674_v40 = vadd.f32 %v1592_v8, %v658_v38  ;;  %v797_v38 = vld [vmem:[%s1787_s6] sm:$0xff] }
 0x15c   :  { %v462_v41 = vpop.f32.mrf.mxu2  ;;  %v527_v42 = vpop.f32.mrf.mxu3  ;;  %871 = vmatpush.msrb.mxu1 %v797_v38 }
 0x15d   :  { %v561_v43 = vadd.f32 %v1580_v3, %v462_v41  ;;  %v627_v44 = vadd.f32 %v1580_v3, %v527_v42  ;;  %v690_v45 = vmax.f32 %v610_v39, %v674_v40 }
 0x15f   :  { %v577_v46 = vmax.f32 %v561_v43, 0.0  ;;  %v643_v47 = vmax.f32 %v627_v44, 0.0  ;;  %756 = vmatmul.f32.gmra.mxu0 %v690_v45 }
 0x161   :  { %v594_v48 = vmul.f32 %v1586_v6, %v577_v46  ;;  %v659_v49 = vmul.f32 %v1586_v6, %v643_v47 }
 0x163   :  { %v611_v50 = vadd.f32 %v1592_v8, %v594_v48  ;;  %v675_v51 = vadd.f32 %v1592_v8, %v659_v49 }
 0x164   :  { %v465_v52 = vpop.f32.mrf.mxu2  ;;  %v530_v53 = vpop.f32.mrf.mxu3 }
 0x165   :  { %v562_v54 = vadd.f32 %v1580_v3, %v465_v52  ;;  %v628_v55 = vadd.f32 %v1580_v3, %v530_v53  ;;  %v691_v56 = vmax.f32 %v611_v50, %v675_v51 }
 0x167   :  { %v578_v57 = vmax.f32 %v562_v54, 0.0  ;;  %v644_v58 = vmax.f32 %v628_v55, 0.0  ;;  %759 = vmatmul.f32.gmra.mxu0 %v691_v56 }
 0x169   :  { %v595_v59 = vmul.f32 %v1586_v6, %v578_v57  ;;  %v660_v61 = vmul.f32 %v1586_v6, %v644_v58 }
 0x16b   :  { %v612_v62 = vadd.f32 %v1592_v8, %v595_v59  ;;  %v676_v63 = vadd.f32 %v1592_v8, %v660_v61 }
 0x16c   :  { %v468_v1 = vpop.f32.mrf.mxu2  ;;  %v533_v2 = vpop.f32.mrf.mxu3 }
 0x16d   :  { %v563_v60 = vadd.f32 %v1580_v3, %v468_v1  ;;  %v629_v4 = vadd.f32 %v1580_v3, %v533_v2  ;;  %v692_v5 = vmax.f32 %v612_v62, %v676_v63 }
 0x16f   :  { %v579_v7 = vmax.f32 %v563_v60, 0.0  ;;  %v645_v0 = vmax.f32 %v629_v4, 0.0  ;;  %762 = vmatmul.f32.gmra.mxu0 %v692_v5  ;;  %v1715_v4 = vld [vmem:[%s1789_s8] ss:$0 sm:$0xff] }
 0x171   :  { %v596_v9 = vmul.f32 %v1586_v6, %v579_v7  ;;  %v661_v10 = vmul.f32 %v1586_v6, %v645_v0 }
 0x173   :  { %v613_v12 = vadd.f32 %v1592_v8, %v596_v9  ;;  %v677_v13 = vadd.f32 %v1592_v8, %v661_v10 }
 0x174   :  { %v471_v16 = vpop.f32.mrf.mxu2  ;;  %v536_v17 = vpop.f32.mrf.mxu3 }
 0x175   :  { %v564_v18 = vadd.f32 %v1580_v3, %v471_v16  ;;  %v630_v19 = vadd.f32 %v1580_v3, %v536_v17  ;;  %v693_v20 = vmax.f32 %v613_v12, %v677_v13 }
 0x177   :  { %v580_v21 = vmax.f32 %v564_v18, 0.0  ;;  %v646_v22 = vmax.f32 %v630_v19, 0.0  ;;  %765 = vmatmul.f32.gmra.mxu0 %v693_v20 }
 0x179   :  { %v597_v25 = vmul.f32 %v1586_v6, %v580_v21  ;;  %v662_v26 = vmul.f32 %v1586_v6, %v646_v22 }
 0x17b   :  { %v614_v27 = vadd.f32 %v1592_v8, %v597_v25  ;;  %v678_v28 = vadd.f32 %v1592_v8, %v662_v26 }
 0x17c   :  { %v474_v30 = vpop.f32.mrf.mxu2  ;;  %v539_v31 = vpop.f32.mrf.mxu3 }
 0x17d   :  { %v565_v32 = vadd.f32 %v1580_v3, %v474_v30  ;;  %v631_v33 = vadd.f32 %v1580_v3, %v539_v31  ;;  %v694_v34 = vmax.f32 %v614_v27, %v678_v28 }
 0x17f   :  { %v581_v36 = vmax.f32 %v565_v32, 0.0  ;;  %v647_v37 = vmax.f32 %v631_v33, 0.0  ;;  %768 = vmatmul.f32.gmra.mxu0 %v694_v34 }
 0x181   :  { %v598_v39 = vmul.f32 %v1586_v6, %v581_v36  ;;  %v663_v40 = vmul.f32 %v1586_v6, %v647_v37 }
 0x183   :  { %v615_v41 = vadd.f32 %v1592_v8, %v598_v39  ;;  %v679_v42 = vadd.f32 %v1592_v8, %v663_v40 }
 0x184   :  { %v477_v43 = vpop.f32.mrf.mxu2  ;;  %v542_v44 = vpop.f32.mrf.mxu3 }
 0x185   :  { %v566_v45 = vadd.f32 %v1580_v3, %v477_v43  ;;  %v632_v46 = vadd.f32 %v1580_v3, %v542_v44  ;;  %v695_v47 = vmax.f32 %v615_v41, %v679_v42 }
 0x187   :  { %v582_v48 = vmax.f32 %v566_v45, 0.0  ;;  %v648_v49 = vmax.f32 %v632_v46, 0.0  ;;  %771 = vmatmul.f32.gmra.mxu0 %v695_v47 }
 0x189   :  { %v599_v50 = vmul.f32 %v1586_v6, %v582_v48  ;;  %v664_v51 = vmul.f32 %v1586_v6, %v648_v49 }
 0x18b   :  { %v616_v52 = vadd.f32 %v1592_v8, %v599_v50  ;;  %v680_v53 = vadd.f32 %v1592_v8, %v664_v51 }
 0x18c   :  { %v480_v54 = vpop.f32.mrf.mxu2  ;;  %v545_v55 = vpop.f32.mrf.mxu3 }
 0x18d   :  { %v567_v56 = vadd.f32 %v1580_v3, %v480_v54  ;;  %v633_v57 = vadd.f32 %v1580_v3, %v545_v55  ;;  %v696_v58 = vmax.f32 %v616_v52, %v680_v53 }
 0x18f   :  { %v583_v59 = vmax.f32 %v567_v56, 0.0  ;;  %v649_v61 = vmax.f32 %v633_v57, 0.0  ;;  %774 = vmatmul.f32.gmra.mxu0 %v696_v58 }
 0x191   :  { %v600_v62 = vmul.f32 %v1586_v6, %v583_v59  ;;  %v665_v63 = vmul.f32 %v1586_v6, %v649_v61 }
 0x193   :  { %v617_v1 = vadd.f32 %v1592_v8, %v600_v62  ;;  %v681_v2 = vadd.f32 %v1592_v8, %v665_v63 }
 0x195   :  { %v697_v60 = vmax.f32 %v617_v1, %v681_v2 }
 0x197   :  { %777 = vmatmul.f32.gmra.mxu0 %v697_v60 }
 0x19c   :  { %v733_v3 = vpop.f32.mrf.mxu0 }
 0x19d   :  { %v734_v5 = vadd.f32 %v1715_v4, %v733_v3 }
 0x19f   :  { %v781_v7 = vmax.f32 %v734_v5, 0.0 }
 0x1a1   :  { %1083 = vmatmul.msk.f32.vlgmr.msrb.gmra.mxu1 %vm807_vm1, %v781_v7 }
 0x1a4   :  { %v736_v0 = vpop.f32.mrf.mxu0 }
 0x1a5   :  { %v737_v6 = vadd.f32 %v1715_v4, %v736_v0 }
 0x1a7   :  { %v782_v9 = vmax.f32 %v737_v6, 0.0 }
 0x1a9   :  { %1084 = vmatmul.msk.f32.gmra.mxu1 %vm807_vm1, %v782_v9 }
 0x1ac   :  { %v739_v8 = vpop.f32.mrf.mxu0 }
 0x1ad   :  { %v740_v10 = vadd.f32 %v1715_v4, %v739_v8 }
 0x1af   :  { %v783_v11 = vmax.f32 %v740_v10, 0.0 }
 0x1b1   :  { %1085 = vmatmul.msk.f32.gmra.mxu1 %vm807_vm1, %v783_v11 }
 0x1b4   :  { %v742_v12 = vpop.f32.mrf.mxu0 }
 0x1b5   :  { %v743_v13 = vadd.f32 %v1715_v4, %v742_v12 }
 0x1b7   :  { %v784_v14 = vmax.f32 %v743_v13, 0.0 }
 0x1b9   :  { %1086 = vmatmul.msk.f32.gmra.mxu1 %vm807_vm1, %v784_v14 }
 0x1bc   :  { %v745_v15 = vpop.f32.mrf.mxu0 }
 0x1bd   :  { %v746_v16 = vadd.f32 %v1715_v4, %v745_v15 }
 0x1bf   :  { %v785_v17 = vmax.f32 %v746_v16, 0.0 }
 0x1c1   :  { %1087 = vmatmul.msk.f32.gmra.mxu1 %vm807_vm1, %v785_v17 }
 0x1c4   :  { %v748_v18 = vpop.f32.mrf.mxu0 }
 0x1c5   :  { %v749_v19 = vadd.f32 %v1715_v4, %v748_v18 }
 0x1c7   :  { %v786_v20 = vmax.f32 %v749_v19, 0.0 }
 0x1c9   :  { %1088 = vmatmul.msk.f32.gmra.mxu1 %vm807_vm1, %v786_v20 }
 0x1cc   :  { %v751_v21 = vpop.f32.mrf.mxu0 }
 0x1cd   :  { %v752_v22 = vadd.f32 %v1715_v4, %v751_v21 }
 0x1cf   :  { %v787_v23 = vmax.f32 %v752_v22, 0.0 }
 0x1d1   :  { %1089 = vmatmul.msk.f32.gmra.mxu1 %vm807_vm1, %v787_v23  ;;  %v938_v23 = vld [vmem:[%s1789_s8 + $0x2] sm:$0x1] }
 0x1d4   :  { %v754_v24 = vpop.f32.mrf.mxu0 }
 0x1d5   :  { %v755_v25 = vadd.f32 %v1715_v4, %v754_v24  ;;  %v1166_v24 = vmov 0  }
 0x1d6   :  { %1127 = vset.pattern.permute.xlu0 %v1166_v24 }
 0x1d7   :  { %v788_v26 = vmax.f32 %v755_v25, 0.0  ;;  %941 = vperm.xlu0 %1127, %v938_v23  }
 0x1d9   :  { %1090 = vmatmul.msk.f32.gmra.mxu1 %vm807_vm1, %v788_v26 }
 0x1dc   :  { %v757_v27 = vpop.f32.mrf.mxu0 }
 0x1dd   :  { %v758_v28 = vadd.f32 %v1715_v4, %v757_v27 }
 0x1df   :  { %v789_v29 = vmax.f32 %v758_v28, 0.0 }
 0x1e1   :  { %1091 = vmatmul.msk.f32.gmra.mxu1 %vm807_vm1, %v789_v29 }
 0x1e4   :  { %v760_v30 = vpop.f32.mrf.mxu0 }
 0x1e5   :  { %v761_v31 = vadd.f32 %v1715_v4, %v760_v30 }
 0x1e7   :  { %v790_v32 = vmax.f32 %v761_v31, 0.0 }
 0x1e9   :  { %1092 = vmatmul.msk.f32.gmra.mxu1 %vm807_vm1, %v790_v32 }
 0x1ec   :  { %v763_v33 = vpop.f32.mrf.mxu0 }
 0x1ed   :  { %v764_v34 = vadd.f32 %v1715_v4, %v763_v33 }
 0x1ef   :  { %v791_v35 = vmax.f32 %v764_v34, 0.0 }
 0x1f1   :  { %1093 = vmatmul.msk.f32.gmra.mxu1 %vm807_vm1, %v791_v35 }
 0x1f4   :  { %v766_v36 = vpop.f32.mrf.mxu0 }
 0x1f5   :  { %v767_v37 = vadd.f32 %v1715_v4, %v766_v36 }
 0x1f7   :  { %v792_v38 = vmax.f32 %v767_v37, 0.0 }
 0x1f9   :  { %1094 = vmatmul.msk.f32.gmra.mxu1 %vm807_vm1, %v792_v38  ;;  %v937_v38 = vld [vmem:[%s1788_s7] sm:$0x1] }
 0x1fc   :  { %v769_v39 = vpop.f32.mrf.mxu0 }
 0x1fd   :  { %v770_v40 = vadd.f32 %v1715_v4, %v769_v39 }
 0x1ff   :  { %v793_v41 = vmax.f32 %v770_v40, 0.0 }
 0x201   :  { %1095 = vmatmul.msk.f32.gmra.mxu1 %vm807_vm1, %v793_v41 }
 0x204   :  { %v772_v42 = vpop.f32.mrf.mxu0 }
 0x205   :  { %v773_v43 = vadd.f32 %v1715_v4, %v772_v42 }
 0x207   :  { %v794_v44 = vmax.f32 %v773_v43, 0.0 }
 0x209   :  { %1096 = vmatmul.msk.f32.gmra.mxu1 %vm807_vm1, %v794_v44 }
 0x20c   :  { %v775_v45 = vpop.f32.mrf.mxu0 }
 0x20d   :  { %v776_v46 = vadd.f32 %v1715_v4, %v775_v45 }
 0x20f   :  { %v795_v47 = vmax.f32 %v776_v46, 0.0 }
 0x211   :  { %1097 = vmatmul.msk.f32.gmra.mxu1 %vm807_vm1, %v795_v47 }
 0x214   :  { %v778_v48 = vpop.f32.mrf.mxu0 }
 0x215   :  { %v779_v49 = vadd.f32 %v1715_v4, %v778_v48  ;;  %v1135_v4 = vld [vmem:[%s1789_s8 + $0x1] ss:$0 sm:$0xff] }
 0x217   :  { %v796_v50 = vmax.f32 %v779_v49, 0.0 }
 0x219   :  { %1098 = vmatmul.msk.f32.gmra.mxu1 %vm807_vm1, %v796_v50 }
 0x21e   :  { %v1749_v51 = vpop.f32.mrf.mxu1 }
 0x21f   :  { %v874_v35 = vadd.f32 %v1135_v4, %v1749_v51 }
 0x221   :  { %v921_v37 = vmax.f32 %v874_v35, 0.0 }
 0x226   :  { %v876_v52 = vpop.f32.mrf.mxu1 }
 0x227   :  { %v877_v33 = vadd.f32 %v1135_v4, %v876_v52 }
 0x229   :  { %v922_v36 = vmax.f32 %v877_v33, 0.0 }
 0x22e   :  { %v879_v53 = vpop.f32.mrf.mxu1 }
 0x22f   :  { %v880_v31 = vadd.f32 %v1135_v4, %v879_v53 }
 0x231   :  { %v923_v34 = vmax.f32 %v880_v31, 0.0 }
 0x236   :  { %v882_v54 = vpop.f32.mrf.mxu1 }
 0x237   :  { %v883_v29 = vadd.f32 %v1135_v4, %v882_v54 }
 0x239   :  { %v924_v32 = vmax.f32 %v883_v29, 0.0 }
 0x23e   :  { %v885_v55 = vpop.f32.mrf.mxu1 }
 0x23f   :  { %v886_v27 = vadd.f32 %v1135_v4, %v885_v55 }
 0x241   :  { %v925_v30 = vmax.f32 %v886_v27, 0.0 }
 0x246   :  { %v888_v56 = vpop.f32.mrf.mxu1 }
 0x247   :  { %v889_v25 = vadd.f32 %v1135_v4, %v888_v56 }
 0x249   :  { %v926_v28 = vmax.f32 %v889_v25, 0.0  ;;  %v942_v39 = vpop.permute.xlu0 %941 }
 0x24e   :  { %v891_v57 = vpop.f32.mrf.mxu1 }
 0x24f   :  { %v892_v21 = vadd.f32 %v1135_v4, %v891_v57 }
 0x251   :  { %v927_v26 = vmax.f32 %v892_v21, 0.0 }
 0x256   :  { %v894_v58 = vpop.f32.mrf.mxu1 }
 0x257   :  { %v895_v19 = vadd.f32 %v1135_v4, %v894_v58 }
 0x259   :  { %v928_v22 = vmax.f32 %v895_v19, 0.0 }
 0x25e   :  { %v897_v59 = vpop.f32.mrf.mxu1 }
 0x25f   :  { %v898_v17 = vadd.f32 %v1135_v4, %v897_v59 }
 0x261   :  { %v929_v20 = vmax.f32 %v898_v17, 0.0 }
 0x266   :  { %v900_v61 = vpop.f32.mrf.mxu1 }
 0x267   :  { %v901_v15 = vadd.f32 %v1135_v4, %v900_v61 }
 0x269   :  { %v930_v18 = vmax.f32 %v901_v15, 0.0 }
 0x26e   :  { %v903_v62 = vpop.f32.mrf.mxu1 }
 0x26f   :  { %v904_v13 = vadd.f32 %v1135_v4, %v903_v62 }
 0x271   :  { %v931_v16 = vmax.f32 %v904_v13, 0.0 }
 0x276   :  { %v906_v63 = vpop.f32.mrf.mxu1 }
 0x277   :  { %v907_v11 = vadd.f32 %v1135_v4, %v906_v63 }
 0x279   :  { %v932_v14 = vmax.f32 %v907_v11, 0.0 }
 0x27e   :  { %v909_v1 = vpop.f32.mrf.mxu1 }
 0x27f   :  { %v910_v8 = vadd.f32 %v1135_v4, %v909_v1 }
 0x281   :  { %v933_v12 = vmax.f32 %v910_v8, 0.0 }
 0x286   :  { %v912_v2 = vpop.f32.mrf.mxu1 }
 0x287   :  { %v913_v6 = vadd.f32 %v1135_v4, %v912_v2 }
 0x289   :  { %v934_v10 = vmax.f32 %v913_v6, 0.0 }
 0x28e   :  { %v915_v60 = vpop.f32.mrf.mxu1 }
 0x28f   :  { %v916_v7 = vadd.f32 %v1135_v4, %v915_v60 }
 0x291   :  { %v935_v9 = vmax.f32 %v916_v7, 0.0 }
 0x296   :  { %v918_v3 = vpop.f32.mrf.mxu1 }
 0x297   :  { %v919_v5 = vadd.f32 %v1135_v4, %v918_v3 }
 0x299   :  { %v936_v0 = vmax.f32 %v919_v5, 0.0 }
 0x29b   :  { %1099 = vmatpush.xpose.msk.msra.mxu2 %vm57_vm0, %v936_v0 }
 0x29f   :  { %1100 = vmatpush.xpose.msk.msra.mxu2 %vm57_vm0, %v935_v9 }
 0x2a3   :  { %1101 = vmatpush.xpose.msk.msra.mxu2 %vm57_vm0, %v934_v10 }
 0x2a7   :  { %1102 = vmatpush.xpose.msk.msra.mxu2 %vm57_vm0, %v933_v12 }
 0x2ab   :  { %1103 = vmatpush.xpose.msk.msra.mxu2 %vm57_vm0, %v932_v14 }
 0x2af   :  { %1104 = vmatpush.xpose.msk.msra.mxu2 %vm57_vm0, %v931_v16 }
 0x2b3   :  { %1105 = vmatpush.xpose.msk.msra.mxu2 %vm57_vm0, %v930_v18 }
 0x2b7   :  { %1106 = vmatpush.xpose.msk.msra.mxu2 %vm57_vm0, %v929_v20 }
 0x2bb   :  { %1107 = vmatpush.xpose.msk.msra.mxu2 %vm57_vm0, %v928_v22 }
 0x2bf   :  { %1108 = vmatpush.xpose.msk.msra.mxu2 %vm57_vm0, %v927_v26 }
 0x2c3   :  { %1109 = vmatpush.xpose.msk.msra.mxu2 %vm57_vm0, %v926_v28 }
 0x2c7   :  { %1110 = vmatpush.xpose.msk.msra.mxu2 %vm57_vm0, %v925_v30 }
 0x2cb   :  { %1111 = vmatpush.xpose.msk.msra.mxu2 %vm57_vm0, %v924_v32 }
 0x2cf   :  { %1112 = vmatpush.xpose.msk.msra.mxu2 %vm57_vm0, %v923_v34 }
 0x2d3   :  { %1113 = vmatpush.xpose.msk.msra.mxu2 %vm57_vm0, %v922_v36 }
 0x2d7   :  { %1114 = vmatpush.xpose.msk.msra.mxu2 %vm57_vm0, %v921_v37 }
 0x2da   :  { %1115 = vmatmul.msk.f32.vlgmr.msra.gmra.mxu2 %vm57_vm0, %v937_v38 }
 0x35d   :  { %v1012_v40 = vpop.f32.mrf.mxu2 }
 0x35e   :  { %v1013_v41 = vadd.f32 %v1012_v40, %v942_v39 }
 0x360   :  { %v1116_v42 = vmul.f32 -1.442695, %v1013_v41 }
 0x362   :  { %1136 = vpow2.f32 %v1116_v42 }
 0x368   :  { %v1137_v43 = vpop.eup %1136 }
 0x369   :  { %v1018_v44 = vadd.f32 1.0, %v1137_v43 }
 0x36b   :  { %1138 = vrcp.f32 %v1018_v44  ;;  %v1030_v48 = vand.u32 2147483648, %v1018_v44  ;;  %v1028_v50 = vand.u32 2147483647, %v1018_v44  ;;  %vm1024_vm3 = vweird.f32 %v1018_v44 }
 0x36d   :  { %v1031_v52 = vor.u32 1.1754944e-38, %v1030_v48  ;;  %vm1029_vm5 = vcmp.eq.f32.partialorder %v1028_v50, 8.507059e+37 }
 0x371   :  { %v1139_v45 = vpop.eup %1138 }
 0x372   :  { %v1020_v46 = vmul.f32 %v1139_v45, %v1018_v44  ;;  %vm1025_vm2 = vweird.f32 %v1139_v45 }
 0x373   :  { %vm1026_vm4 = vmor %vm1024_vm3, %vm1025_vm2 }
 0x374   :  { %v1021_v47 = vsub.f32 1.0, %v1020_v46 }
 0x376   :  { %v1022_v49 = vmul.f32 %v1139_v45, %v1021_v47 }
 0x378   :  { %v1023_v51 = vadd.f32 %v1139_v45, %v1022_v49 }
 0x37a   :  { %v1027_v53 = vsel %vm1026_vm4, %v1139_v45, %v1023_v51 }
 0x37b   :  { %v1032_v54 = vsel %vm1029_vm5, %v1031_v52, %v1027_v53 }
 0x37c   :  { %1034 = vst [vmem:[#allocation2] sm:$0x1] %v1032_v54 }
 0x37d   :  { %1045 = dma.vmem_to_hbm [thread:$0]  %s1041_s5, 16, %s1043_s23, [#allocation3]  }
 0x37e   :  { %1164 = dma.done.wait [#allocation3], 16  }
 0x37f   :  { %1165 = vsyncadd [#allocation3], 4294967280 }
 0x380   :  { %1050 = vsyncpa [#allocation3], 1 }

</bundles_post_ra>
